<compile_context>
chip_gen: v6e
topology: v6e:2x2x1
jax: 0.10.0
libtpu: 0.0.40
codegen_flags: <defaults>
</compile_context>

<pallas_src>
import jax
import jax.numpy as jnp
from jax.experimental import pallas as pl
from jax.experimental.pallas import tpu as pltpu

EPS = 1e-5
_VMEM_BUDGET = 48 << 20   # stay comfortably inside v7x's 64 MiB physical VMEM


def _instance_norm_kernel(x_ref, o_ref):
    x = x_ref[...].astype(jnp.float32)                            # (rows_blk, HW)
    mean = jnp.mean(x, axis=-1, keepdims=True)                    # (rows_blk, 1)
    centered = x - mean
    var = jnp.mean(centered * centered, axis=-1, keepdims=True)   # biased variance
    inv_std = jax.lax.rsqrt(var + EPS)                            # EUP, per row only
    o_ref[...] = (centered * inv_std).astype(o_ref.dtype)


def _block_footprint_bytes(block_rows, hw, itemsize):
    # double-buffered in + out tiles, plus in-kernel f32 working copies
    return 2 * 2 * block_rows * hw * itemsize + 2 * block_rows * hw * 4


def _choose_block_rows(rows, hw, itemsize):
    """Pick block_rows: ~2 MiB input tile, multiple of the sublane packing,
    >=2 grid steps when rows allow it, and footprint within the VMEM budget."""
    sub = max(8, 32 // max(1, itemsize))        # 8 for f32, 16 for bf16, 32 for i8
    target_bytes = 2 << 20                      # ~2 MiB input tile
    br = (target_bytes // max(1, hw * itemsize)) // sub * sub
    br = max(sub, br)
    # Shrink if the pipelined footprint would blow past the VMEM budget
    # (only matters for very large H*W).
    while br > sub and _block_footprint_bytes(br, hw, itemsize) > _VMEM_BUDGET:
        br = max(sub, (br // 2) // sub * sub)
    if br >= rows:
        return rows                             # full dim -> no (8,128) divisibility rule
    # Keep at least 2 grid steps so v7x can shard the row axis over both TCs.
    half = (rows // 2) // sub * sub
    if half >= sub:
        br = min(br, half)
    return br


@jax.jit
def instance_whitening(x):
    """InstanceNorm2d(affine=False) on NCHW input. Returns (y, w) with w == y."""
    N, C, H, W = x.shape
    rows = N * C
    hw = H * W
    itemsize = jnp.dtype(x.dtype).itemsize
    x2 = x.reshape(rows, hw)                    # contiguous NCHW -> free reshape

    block_rows = _choose_block_rows(rows, hw, itemsize)
    grid = (pl.cdiv(rows, block_rows),)

    vmem_limit = int(min(
        _block_footprint_bytes(block_rows, hw, itemsize) + (4 << 20),  # headroom
        64 << 20,
    ))

    cost = pl.CostEstimate(
        flops=int(5 * rows * hw),
        transcendentals=int(rows),
        bytes_accessed=int(2 * rows * hw * itemsize),
    )

    out = pl.pallas_call(
        _instance_norm_kernel,
        out_shape=jax.ShapeDtypeStruct((rows, hw), x.dtype),
        grid_spec=pltpu.PrefetchScalarGridSpec(
            num_scalar_prefetch=0,
            grid=grid,
            in_specs=[pl.BlockSpec((block_rows, hw), lambda i: (i, 0))],
            out_specs=pl.BlockSpec((block_rows, hw), lambda i: (i, 0)),
        ),
        compiler_params=pltpu.CompilerParams(
            dimension_semantics=("parallel",),
            vmem_limit_bytes=vmem_limit,
        ),
        cost_estimate=cost,
    )(x2)

    out = out.reshape(N, C, H, W)
    return out, out  # module returns (x, w) with w = x


def _reference(x):
    xf = x.astype(jnp.float32)
    mean = jnp.mean(xf, axis=(2, 3), keepdims=True)
    var = jnp.mean((xf - mean) ** 2, axis=(2, 3), keepdims=True)
    y = (xf - mean) / jnp.sqrt(var + EPS)
    return y.astype(x.dtype)


def _check(x):
    y, w = instance_whitening(x)
    jax.block_until_ready(y)
    jax.block_until_ready(w)
    ref = _reference(x)
    assert y.shape == x.shape and w.shape == x.shape
    assert jnp.allclose(y, ref, atol=1e-4, rtol=1e-4)
    assert jnp.array_equal(y, w)


if __name__ == "__main__":
    key = jax.random.PRNGKey(0)

    # Primary check: shapes implied by the module (batch=2, channels=4, 16x16).
    # Single full-extent block, grid=(1,).
    x = jax.random.normal(key, (2, 4, 16, 16), dtype=jnp.float32)
    _check(x)

    # Row count not a multiple of 8 (full-dim block path, no (8,128) rule).
    k2, k3, k4 = jax.random.split(key, 3)
    _check(jax.random.normal(k2, (3, 5, 16, 16), dtype=jnp.float32))

    # Multi-block grid path (rows=256, hw=4096 -> block_rows=128, grid=(2,)).
    _check(jax.random.normal(k3, (4, 64, 64, 64), dtype=jnp.float32))

    # Partial last block path (rows=200, block_rows=96 -> grid=(3,), masked tail).
    _check(jax.random.normal(k4, (8, 25, 64, 64), dtype=jnp.float32))

    print("KERNEL_OK")
</pallas_src>

<mosaic_0001>
module attributes {stable_mosaic.version = 11 : i64} {
  func.func @_instance_norm_kernel(%arg0: i32, %arg1: memref<8x256xf32, #tpu.memory_space<vmem>>, %arg2: memref<8x256xf32, #tpu.memory_space<vmem>>) attributes {dimension_semantics = [#tpu.dimension_semantics<parallel>], iteration_bounds = array<i64: 1>, scalar_prefetch = 0 : i64, scratch_operands = 0 : i64, tpu.core_type = #tpu.core_type<tc>, window_params = [{transform_indices = @transform_0, window_bounds = array<i64: 8, 256>}, {transform_indices = @transform_1, window_bounds = array<i64: 8, 256>}]} {
    %c0 = arith.constant 0 : index
    %c0_0 = arith.constant 0 : index
    %0 = vector.load %arg1[%c0, %c0_0] : memref<8x256xf32, #tpu.memory_space<vmem>>, vector<8x256xf32>
    %cst = arith.constant dense<0.000000e+00> : vector<8xf32>
    %1 = vector.multi_reduction <add>, %0, %cst [1] : vector<8x256xf32> to vector<8xf32>
    %2 = vector.shape_cast %1 : vector<8xf32> to vector<8x1xf32>
    %cst_1 = arith.constant 2.560000e+02 : f32
    %3 = vector.broadcast %cst_1 : f32 to vector<8x1xf32>
    %4 = arith.divf %2, %3 : vector<8x1xf32>
    %5 = vector.broadcast %4 : vector<8x1xf32> to vector<8x256xf32>
    %6 = arith.subf %0, %5 : vector<8x256xf32>
    %7 = arith.mulf %6, %6 : vector<8x256xf32>
    %cst_2 = arith.constant dense<0.000000e+00> : vector<8xf32>
    %8 = vector.multi_reduction <add>, %7, %cst_2 [1] : vector<8x256xf32> to vector<8xf32>
    %9 = vector.shape_cast %8 : vector<8xf32> to vector<8x1xf32>
    %cst_3 = arith.constant 2.560000e+02 : f32
    %10 = vector.broadcast %cst_3 : f32 to vector<8x1xf32>
    %11 = arith.divf %9, %10 : vector<8x1xf32>
    %cst_4 = arith.constant 9.99999974E-6 : f32
    %12 = vector.broadcast %cst_4 : f32 to vector<8x1xf32>
    %13 = arith.addf %11, %12 : vector<8x1xf32>
    %14 = math.rsqrt %13 : vector<8x1xf32>
    %15 = vector.broadcast %14 : vector<8x1xf32> to vector<8x256xf32>
    %16 = arith.mulf %6, %15 : vector<8x256xf32>
    %c0_5 = arith.constant 0 : index
    %c0_6 = arith.constant 0 : index
    %17 = vector.load %arg2[%c0_5, %c0_6] : memref<8x256xf32, #tpu.memory_space<vmem>>, vector<8x256xf32>
    tpu.vector_store %arg2[%c0_5, %c0_6], %16 {strides = array<i32>} : memref<8x256xf32, #tpu.memory_space<vmem>>, vector<8x256xf32>,
    return
  }
  func.func @transform_0(%arg0: i32) -> (i32, i32) {
    %c0_i32 = arith.constant 0 : i32
    %c0_i32_0 = arith.constant 0 : i32
    return %arg0, %c0_i32 : i32, i32
  }
  func.func @transform_1(%arg0: i32) -> (i32, i32) {
    %c0_i32 = arith.constant 0 : i32
    %c0_i32_0 = arith.constant 0 : i32
    return %arg0, %c0_i32 : i32, i32
  }
}

</mosaic_0001>

<bundles_post_ra>
// kernel: instance_whitening.1
= control target key start
LH: loop header
LB: loop body
LE: loop exit
PB: predicated region body
PF: predicated region fallthrough
CT: control target
= control target key end

     0   :  { %s57_s0 = inlined_call_operand.vmem [shape: f32[8,256], index: 0, kind: input, shape index: {}]   ;;  %s58_s1 = inlined_call_operand.vmem [shape: f32[8,256], index: 1, kind: output, shape index: {}]  }
   0x1   :  { %v8_v0 = vld [vmem:[%s57_s0] sm:$0xff]  ;;  %v9_v1 = vld [vmem:[%s57_s0 + $0x8] sm:$0xff] }
   0x2   :  { %v10_v2 = vadd.f32 %v9_v1, %v8_v0 }
   0x4   :  { %11 = vadd.xlane.f32.xlu0 %v10_v2 }
  0x8d   :  { %v12_v3 = vpop.xlane.xlu0 %11 }
  0x8e   :  { %v14_v4 = vmul.f32 0.00390625, %v12_v3 }
  0x90   :  { %v15_v5 = vsub.f32 %v8_v0, %v14_v4  ;;  %v16_v6 = vsub.f32 %v9_v1, %v14_v4 }
  0x92   :  { %v17_v7 = vmul.f32 %v15_v5, %v15_v5  ;;  %v18_v8 = vmul.f32 %v16_v6, %v16_v6 }
  0x94   :  { %v19_v9 = vadd.f32 %v18_v8, %v17_v7 }
  0x96   :  { %20 = vadd.xlane.f32.xlu0 %v19_v9 }
 0x11f   :  { %v21_v10 = vpop.xlane.xlu0 %20 }
 0x120   :  { %v22_v11 = vmul.f32 0.00390625, %v21_v10 }
 0x122   :  { %v23_v12 = vadd.f32 1e-05, %v22_v11 }
 0x124   :  { %33 = vrsqrt.f32 %v23_v12 }
 0x131   :  { %v34_v13 = vpop.eup %33 }
 0x132   :  { %v25_v14 = vmul.f32 %v34_v13, %v15_v5  ;;  %v26_v15 = vmul.f32 %v34_v13, %v16_v6 }
 0x134   :  { %27 = vst [vmem:[%s58_s1] sm:$0xff] %v25_v14  ;;  %28 = vst [vmem:[%s58_s1 + $0x8] sm:$0xff] %v26_v15 }

</bundles_post_ra>
